<compile_context>
chip_gen: v6e
topology: v6e:2x2x1
jax: 0.10.0
libtpu: 0.0.40
codegen_flags: <defaults>
</compile_context>

<pallas_src>
import jax
import jax.numpy as jnp
from jax.experimental import pallas as pl
from jax.experimental.pallas import tpu as pltpu


# ----------------------------------------------------------------------------
# Kernel: lane-dense tiled copy (the only on-device work an identity flow has).
# ----------------------------------------------------------------------------
def _copy_kernel(x_ref, z_ref):
    z_ref[...] = x_ref[...]


def _choose_2d_view(shape, itemsize):
    """Pick an exact (rows, lane) factorization of the flat element count.

    lane is a multiple of 128 whenever one divides the size exactly (unmasked
    lane-dense `vst` stores); row_block targets ~2 MiB tiles so that
    2 arrays x 2 pipeline buffers x tile stays well under the default scoped
    VMEM limit on every TPU generation (v5e 16 MiB ... v7x 32 MiB).
    """
    n = 1
    for d in shape:
        n *= int(d)
    lane = None
    for cand in (512, 256, 128):
        if n % cand == 0:
            lane = cand
            break
    if lane is None:
        # TODO(synk): size has no multiple-of-128 divisor; fall back to the
        # original trailing dim as a full-extent (possibly masked) lane dim.
        lane = int(shape[-1]) if len(shape) else 1
    rows = n // lane

    target_tile_bytes = 2 * 1024 * 1024
    cap = max(8, (target_tile_bytes // (lane * itemsize)) // 8 * 8)
    if rows <= cap:
        row_block = rows      # single full-extent tile (allowed even if %8 != 0)
    else:
        row_block = cap       # multiple of 8; ragged last block masked by Pallas
    return n, rows, lane, row_block


# ----------------------------------------------------------------------------
# Forward / inverse wrappers.
# ----------------------------------------------------------------------------
def flownet_forward(x, materialize_z=True):
    """FlowNetModel.forward: z = identity(x), log_det = zeros(batch).

    materialize_z=True  -> z is a fresh buffer produced by the Pallas copy
                           kernel (safe for callers that mutate/donate x).
    materialize_z=False -> zero-cost path: z aliases x at the JAX level, no
                           kernel dispatch at all.
    """
    B = x.shape[0]
    log_det = jnp.zeros((B,), jnp.float32)   # built in the wrapper, not a kernel

    if not materialize_z:
        return x, log_det

    itemsize = jnp.dtype(x.dtype).itemsize
    _, rows, lane, row_block = _choose_2d_view(x.shape, itemsize)
    x2d = x.reshape(rows, lane)              # exact factorization: no pad, no slice

    z2d = pl.pallas_call(
        _copy_kernel,
        out_shape=jax.ShapeDtypeStruct((rows, lane), x.dtype),
        grid=(pl.cdiv(rows, row_block),),
        in_specs=[pl.BlockSpec((row_block, lane), lambda i: (i, 0))],
        out_specs=pl.BlockSpec((row_block, lane), lambda i: (i, 0)),
        compiler_params=pltpu.CompilerParams(
            dimension_semantics=("parallel",),   # shards across v7x's 2 TCs
        ),
    )(x2d)

    z = z2d.reshape(x.shape)
    return z, log_det


def flownet_inverse(z):
    """FlowNetModel.inverse: identity — no kernel, no log_det work."""
    return z


# ----------------------------------------------------------------------------
# Self-test.
# ----------------------------------------------------------------------------
if __name__ == "__main__":
    # FlowNetModel(levels=4, depth=4, channels=3): levels/depth unused by the
    # reference forward (pure identity flow), channels=3.
    key = jax.random.PRNGKey(0)
    B, C, H, W = 2, 3, 16, 16
    x = jax.random.normal(key, (B, C, H, W), dtype=jnp.float32)

    # Pallas copy path (fresh z buffer).
    z, log_det = flownet_forward(x)
    jax.block_until_ready((z, log_det))
    assert z.shape == (B, C, H, W)
    assert log_det.shape == (B,)
    assert bool(jnp.array_equal(z, x))
    assert bool(jnp.all(log_det == 0.0))

    # Zero-cost path (no kernel).
    z0, log_det0 = flownet_forward(x, materialize_z=False)
    jax.block_until_ready((z0, log_det0))
    assert bool(jnp.array_equal(z0, x))
    assert bool(jnp.all(log_det0 == 0.0))

    # Inverse (identity, no kernel).
    x_rec = flownet_inverse(z)
    jax.block_until_ready(x_rec)
    assert bool(jnp.array_equal(x_rec, x))

    print("KERNEL_OK")
</pallas_src>

<mosaic_0001>
module attributes {stable_mosaic.version = 11 : i64} {
  func.func @_copy_kernel(%arg0: i32, %arg1: memref<3x512xf32, #tpu.memory_space<vmem>>, %arg2: memref<3x512xf32, #tpu.memory_space<vmem>>) attributes {dimension_semantics = [#tpu.dimension_semantics<parallel>], iteration_bounds = array<i64: 1>, scalar_prefetch = 0 : i64, scratch_operands = 0 : i64, tpu.core_type = #tpu.core_type<tc>, window_params = [{transform_indices = @transform_0, window_bounds = array<i64: 3, 512>}, {transform_indices = @transform_1, window_bounds = array<i64: 3, 512>}]} {
    %c0 = arith.constant 0 : index
    %c0_0 = arith.constant 0 : index
    %0 = vector.load %arg1[%c0, %c0_0] : memref<3x512xf32, #tpu.memory_space<vmem>>, vector<3x512xf32>
    %c0_1 = arith.constant 0 : index
    %c0_2 = arith.constant 0 : index
    %1 = vector.load %arg2[%c0_1, %c0_2] : memref<3x512xf32, #tpu.memory_space<vmem>>, vector<3x512xf32>
    tpu.vector_store %arg2[%c0_1, %c0_2], %0 {strides = array<i32>} : memref<3x512xf32, #tpu.memory_space<vmem>>, vector<3x512xf32>,
    return
  }
  func.func @transform_0(%arg0: i32) -> (i32, i32) {
    %c0_i32 = arith.constant 0 : i32
    %c0_i32_0 = arith.constant 0 : i32
    return %arg0, %c0_i32 : i32, i32
  }
  func.func @transform_1(%arg0: i32) -> (i32, i32) {
    %c0_i32 = arith.constant 0 : i32
    %c0_i32_0 = arith.constant 0 : i32
    return %arg0, %c0_i32 : i32, i32
  }
}

</mosaic_0001>

<bundles_post_ra>
// kernel: tpu_custom_call.1
= control target key start
LH: loop header
LB: loop body
LE: loop exit
PB: predicated region body
PF: predicated region fallthrough
CT: control target
= control target key end

     0   :  { %6 = vsyncpa [#allocation3], 0  ;;  %s104_s0 = inlined_call_operand.hbm [shape: f32[3,512], index: 0, kind: input, shape index: {}]   ;;  %s105_s1 = inlined_call_operand.hbm [shape: f32[3,512], index: 1, kind: output, shape index: {}]  }
   0x1   :  { %7 = vsyncpa [#allocation4], 0  ;;  %s86_s6 = smov [#allocation2]  }
   0x2   :  { %s14_s7 = sshll.u32 %s86_s6, 4  ;;  %s15_s7 = int_to_ptr.vmem [resolvable:$true] %s14_s7 }
   0x3   :  { %s50_s8 = scalar_lea.vmem %s15_s7, 256  ;;  %p55_p1 = scmp.lt.s32.totalorder %s15_s7, %s15_s7 }
   0x4   :  { %p51_p0 = scmp.ne.s32.totalorder %s15_s7, %s50_s8  ;;  %p56_p2 = scmp.lt.s32.totalorder %s50_s8, %s50_s8 }
   0x6   :  { %p57_p3 = por %p56_p2, %p55_p1 }
   0x8   :  { %p58_p4 = pnand %p57_p3, %p51_p0 }
   0xa   :  { %61 = shalt.err (!%p58_p4)
}
   0xb   :  { %17 = dma.hbm_to_vmem [thread:$0]  %s104_s0, 256, %s15_s7, [#allocation3]  }
   0xc   :  { %82 = dma.done.wait [#allocation3], 256  }
   0xd   :  { %83 = vsyncadd [#allocation3], 4294967040  ;;  %s87_s11 = smov [#allocation5]   ;;  %v21_v0 = vld [vmem:[#allocation2] sm:$0x77] }
   0xe   :  { %s31_s12 = sshll.u32 %s87_s11, 4  ;;  %v22_v1 = vld [vmem:[#allocation2 + $0x8] sm:$0x77]  ;;  %23 = vst [vmem:[#allocation5] sm:$0x77] %v21_v0  ;;  %s32_s12 = int_to_ptr.vmem [resolvable:$true] %s31_s12 }
   0xf   :  { %24 = vst [vmem:[#allocation5 + $0x8] sm:$0x77] %v22_v1  ;;  %s62_s13 = scalar_lea.vmem %s32_s12, 256  ;;  %p67_p6 = scmp.lt.s32.totalorder %s32_s12, %s32_s12 }
  0x10   :  { %p63_p5 = scmp.ne.s32.totalorder %s32_s12, %s62_s13  ;;  %p68_p7 = scmp.lt.s32.totalorder %s62_s13, %s62_s13 }
  0x12   :  { %p69_p8 = por %p68_p7, %p67_p6 }
  0x14   :  { %p70_p9 = pnand %p69_p8, %p63_p5 }
  0x16   :  { %73 = shalt.err (!%p70_p9)
}
  0x17   :  { %34 = dma.vmem_to_hbm [thread:$0]  %s32_s12, 256, %s105_s1, [#allocation4]  }
  0x18   :  { %84 = dma.done.wait [#allocation4], 256  }
  0x19   :  { %85 = vsyncadd [#allocation4], 4294967040 }
  0x1a   :  { %38 = vsyncpa [#allocation3], 1 }
  0x1b   :  { %39 = vsyncpa [#allocation4], 1 }

</bundles_post_ra>
